<compile_context>
chip_gen: v7x
topology: tpu7x:2x2x1
jax: 0.10.0
libtpu: 0.0.40
codegen_flags: <defaults>
</compile_context>

<pallas_src>
import jax
import jax.numpy as jnp
from jax.experimental import pallas as pl
from jax.experimental.pallas import tpu as pltpu


def _round_up(n, m):
    return ((n + m - 1) // m) * m


def _tensorcores_per_chip():
    """Best-effort TensorCores-per-chip (v7x=2, v5e/v6e=1); falls back to 1."""
    try:
        info = pltpu.get_tpu_info()
        for attr in ("num_cores_per_chip", "num_tensorcores", "num_cores", "core_count"):
            v = getattr(info, attr, None)
            if v:
                return int(v)
    except Exception:
        pass
    try:
        v = getattr(jax.devices()[0], "num_cores", None)
        if v:
            return int(v)
    except Exception:
        pass
    return 1


def _make_fcn_kernel(n_input, n_hid_layers, n_halves, half_tile, bf16_tanh):
    """Kernel for one (transposed) batch tile.

    refs = (x, w_in, b_in, [w_hid, b_hid,] w_out, b_out, o)
      x     : [n_input,  tile]
      w_in  : [H, n_input]       b_in  : [H, 1]
      w_hid : [L-1, H, H]        b_hid : [L-1, H, 1]   (stacked hidden layers)
      w_out : [n_out, H]         b_out : [n_out, 1]
      o     : [n_out, tile]
    """

    def act(h):
        if bf16_tanh:
            # bf16 EUP path (v6e/v7x). Do NOT enable on v5e.
            return jnp.tanh(h.astype(jnp.bfloat16)).astype(jnp.float32)
        return jnp.tanh(h)

    def kernel(*refs):
        if n_hid_layers > 0:
            (x_ref, w_in_ref, b_in_ref, w_hid_ref, b_hid_ref,
             w_out_ref, b_out_ref, o_ref) = refs
        else:
            x_ref, w_in_ref, b_in_ref, w_out_ref, b_out_ref, o_ref = refs
            w_hid_ref = b_hid_ref = None

        w_in = w_in_ref[...].astype(jnp.float32)     # [H, n_input]
        b_in = b_in_ref[...].astype(jnp.float32)     # [H, 1]
        w_out = w_out_ref[...].astype(jnp.float32)   # [n_out, H]
        b_out = b_out_ref[...].astype(jnp.float32)   # [n_out, 1]

        # Lane-aligned half-tiles, interleaved so one half's matmul+bias issues
        # while the other half's tanh is still draining through the EUP.
        xs = [x_ref[:, hi * half_tile:(hi + 1) * half_tile].astype(jnp.float32)
              for hi in range(n_halves)]

        # ---- Input layer ----------------------------------------------------
        if n_input == 1:
            # Degenerate K=1 contraction: VPU broadcast multiply-add instead of
            # an MXU matmul (removes MXU push/pop + fill/drain per grid step).
            pre = [w_in * x + b_in for x in xs]      # [H,1]*[1,t]+[H,1] -> [H,t]
        else:
            pre = [jnp.dot(w_in, x, preferred_element_type=jnp.float32) + b_in
                   for x in xs]
        hs = [act(p) for p in pre]

        # ---- Hidden layers (statically unrolled, stacked-weight operand) -----
        for li in range(n_hid_layers):
            w = w_hid_ref[li].astype(jnp.float32)    # [H, H]
            b = b_hid_ref[li].astype(jnp.float32)    # [H, 1]
            pre = [jnp.dot(w, h, preferred_element_type=jnp.float32) + b for h in hs]
            hs = [act(p) for p in pre]

        # ---- Output layer (no activation); lane-dense store -----------------
        for hi in range(n_halves):
            out = jnp.dot(w_out, hs[hi], preferred_element_type=jnp.float32) + b_out
            o_ref[:, hi * half_tile:(hi + 1) * half_tile] = out.astype(o_ref.dtype)

    return kernel


def fcn_forward(x, params, *, max_batch_tile=1024, bf16_tanh=False):
    """FCN forward pass via a Pallas TPU kernel.

    Args:
      x: [batch, N_INPUT] float32 (PyTorch sample-per-row convention).
      params: dict with w_in [H,in], b_in [H,1], w_hid [L-1,H,H], b_hid [L-1,H,1],
              w_out [out,H], b_out [out,1].
    Returns:
      [batch, N_OUTPUT] float32.
    """
    batch, n_input = x.shape
    w_in, b_in = params["w_in"], params["b_in"]
    w_hid, b_hid = params["w_hid"], params["b_hid"]
    w_out, b_out = params["w_out"], params["b_out"]
    n_hidden = int(w_in.shape[0])
    n_output = int(w_out.shape[0])
    n_hid_layers = int(w_hid.shape[0])

    # ---- Batch tiling --------------------------------------------------------
    # Cap tile by vreg pressure (~1024 f32 lanes for [H, tile] activations), not
    # VMEM.  Single-TC chips (v5e/v6e): one grid step (each extra step is ~0.35us
    # of pure overhead on a microsecond kernel).  Multi-TC (v7x): keep >= 2
    # parallel steps so the batch axis shards across both TensorCores.
    # TODO(synk): verify v7x megacore sharding in xprof; may need CORE_PARALLEL.
    padded128 = _round_up(max(batch, 1), 128)
    multi_core = _tensorcores_per_chip() >= 2
    if multi_core and padded128 >= 256:
        tile = min(max_batch_tile, _round_up(pl.cdiv(padded128, 2), 128))
    else:
        tile = min(max_batch_tile, padded128)
    padded = _round_up(padded128, tile)
    grid = padded // tile

    # Interleave two 128-aligned half-tiles when the tile allows it.
    n_halves = 2 if tile % 256 == 0 else 1
    half_tile = tile // n_halves

    # ---- Input layout: batch on the lane axis --------------------------------
    # For N_INPUT == 1 the "transpose" [batch,1] -> [1,batch] is a free
    # row-major reshape (no extra HBM round-trip).  Pad only if ragged.
    xt = x.reshape(1, batch) if n_input == 1 else x.T
    if padded != batch:
        xt = jnp.pad(xt, ((0, 0), (0, padded - batch)))

    kernel = _make_fcn_kernel(n_input, n_hid_layers, n_halves, half_tile, bf16_tanh)

    # x / out tiled over the (lane) batch axis; parameters are full-array blocks
    # with constant block index -> DMA'd once and VMEM-resident across the grid.
    in_specs = [pl.BlockSpec((n_input, tile), lambda i: (0, i)),
                pl.BlockSpec(w_in.shape, lambda i: (0, 0)),
                pl.BlockSpec(b_in.shape, lambda i: (0, 0))]
    operands = [xt, w_in, b_in]
    if n_hid_layers > 0:
        in_specs += [pl.BlockSpec(w_hid.shape, lambda i: (0, 0, 0)),
                     pl.BlockSpec(b_hid.shape, lambda i: (0, 0, 0))]
        operands += [w_hid, b_hid]
    in_specs += [pl.BlockSpec(w_out.shape, lambda i: (0, 0)),
                 pl.BlockSpec(b_out.shape, lambda i: (0, 0))]
    operands += [w_out, b_out]
    out_spec = pl.BlockSpec((n_output, tile), lambda i: (0, i))

    # Scheduling hint for XLA around this small custom call.
    flops = 2 * padded * (n_hidden * n_input
                          + n_hid_layers * n_hidden * n_hidden
                          + n_output * n_hidden)
    transcendentals = padded * n_hidden * (1 + n_hid_layers)
    bytes_accessed = 4 * (padded * (n_input + n_output)
                          + w_in.size + b_in.size + w_hid.size + b_hid.size
                          + w_out.size + b_out.size)
    cost = pl.CostEstimate(flops=int(flops),
                           transcendentals=int(transcendentals),
                           bytes_accessed=int(bytes_accessed))

    out_t = pl.pallas_call(
        kernel,
        out_shape=jax.ShapeDtypeStruct((n_output, padded), jnp.float32),
        grid_spec=pl.GridSpec(grid=(grid,), in_specs=in_specs, out_specs=out_spec),
        compiler_params=pltpu.CompilerParams(dimension_semantics=("parallel",)),
        cost_estimate=cost,
    )(*operands)

    return out_t[:, :batch].T  # [batch, N_OUTPUT]


def init_fcn_params(key, n_input, n_output, n_hidden, n_layers):
    """torch.nn.Linear-style init U(-1/sqrt(fan_in), +1/sqrt(fan_in)).

    Weights stored [fan_out, fan_in] (PyTorch layout); hidden layers stacked.
    """
    def linear(k, fan_in, fan_out):
        kw, kb = jax.random.split(k)
        bound = float(fan_in) ** -0.5
        w = jax.random.uniform(kw, (fan_out, fan_in), jnp.float32, -bound, bound)
        b = jax.random.uniform(kb, (fan_out, 1), jnp.float32, -bound, bound)
        return w, b

    keys = jax.random.split(key, n_layers + 1)
    w_in, b_in = linear(keys[0], n_input, n_hidden)
    hid = [linear(keys[1 + i], n_hidden, n_hidden) for i in range(n_layers - 1)]
    if hid:
        w_hid = jnp.stack([w for w, _ in hid])
        b_hid = jnp.stack([b for _, b in hid])
    else:
        w_hid = jnp.zeros((0, n_hidden, n_hidden), jnp.float32)
        b_hid = jnp.zeros((0, n_hidden, 1), jnp.float32)
    w_out, b_out = linear(keys[-1], n_hidden, n_output)
    return dict(w_in=w_in, b_in=b_in, w_hid=w_hid, b_hid=b_hid,
                w_out=w_out, b_out=b_out)


def fcn_reference(x, params):
    """Pure-JAX reference of the same forward pass (x: [batch, n_input])."""
    h = jnp.tanh(x @ params["w_in"].T + params["b_in"].T)
    for li in range(params["w_hid"].shape[0]):
        h = jnp.tanh(h @ params["w_hid"][li].T + params["b_hid"][li].T)
    return h @ params["w_out"].T + params["b_out"].T


if __name__ == "__main__":
    # PINN usage: scalar-in / scalar-out MLP (1D harmonic oscillator, step force).
    N_INPUT, N_OUTPUT, N_HIDDEN, N_LAYERS = 1, 1, 32, 3
    BATCH = 256

    key = jax.random.PRNGKey(0)
    key, kx = jax.random.split(key)
    x = jax.random.uniform(kx, (BATCH, N_INPUT), jnp.float32, -1.0, 1.0)
    params = init_fcn_params(key, N_INPUT, N_OUTPUT, N_HIDDEN, N_LAYERS)

    out = jax.block_until_ready(fcn_forward(x, params))
    ref = fcn_reference(x, params)
    assert out.shape == (BATCH, N_OUTPUT)
    assert jnp.allclose(out, ref, atol=1e-5, rtol=1e-5), "mismatch vs reference"

    # Ragged-batch path (pad + slice) must also match.
    key, kx2 = jax.random.split(key)
    x2 = jax.random.uniform(kx2, (200, N_INPUT), jnp.float32, -1.0, 1.0)
    out2 = jax.block_until_ready(fcn_forward(x2, params))
    ref2 = fcn_reference(x2, params)
    assert out2.shape == (200, N_OUTPUT)
    assert jnp.allclose(out2, ref2, atol=1e-5, rtol=1e-5), "ragged mismatch vs reference"

    print("KERNEL_OK")
</pallas_src>

<mosaic_0001>
module attributes {stable_mosaic.version = 11 : i64} {
  func.func @kernel(%arg0: i32, %arg1: memref<1x256xf32, #tpu.memory_space<vmem>>, %arg2: memref<32x1xf32, #tpu.memory_space<vmem>>, %arg3: memref<32x1xf32, #tpu.memory_space<vmem>>, %arg4: memref<2x32x32xf32, #tpu.memory_space<vmem>>, %arg5: memref<2x32x1xf32, #tpu.memory_space<vmem>>, %arg6: memref<1x32xf32, #tpu.memory_space<vmem>>, %arg7: memref<1x1xf32, #tpu.memory_space<vmem>>, %arg8: memref<1x256xf32, #tpu.memory_space<vmem>>) attributes {dimension_semantics = [#tpu.dimension_semantics<parallel>], iteration_bounds = array<i64: 1>, scalar_prefetch = 0 : i64, scratch_operands = 0 : i64, tpu.core_type = #tpu.core_type<tc>, window_params = [{transform_indices = @transform_0, window_bounds = array<i64: 1, 256>}, {pipeline_mode = #tpu.pipeline_mode<synchronous>, transform_indices = @transform_1, window_bounds = array<i64: 32, 1>}, {pipeline_mode = #tpu.pipeline_mode<synchronous>, transform_indices = @transform_2, window_bounds = array<i64: 32, 1>}, {pipeline_mode = #tpu.pipeline_mode<synchronous>, transform_indices = @transform_3, window_bounds = array<i64: 2, 32, 32>}, {pipeline_mode = #tpu.pipeline_mode<synchronous>, transform_indices = @transform_4, window_bounds = array<i64: 2, 32, 1>}, {pipeline_mode = #tpu.pipeline_mode<synchronous>, transform_indices = @transform_5, window_bounds = array<i64: 1, 32>}, {pipeline_mode = #tpu.pipeline_mode<synchronous>, transform_indices = @transform_6, window_bounds = array<i64: 1, 1>}, {transform_indices = @transform_7, window_bounds = array<i64: 1, 256>}]} {
    %c0 = arith.constant 0 : index
    %c0_0 = arith.constant 0 : index
    %0 = vector.load %arg2[%c0, %c0_0] : memref<32x1xf32, #tpu.memory_space<vmem>>, vector<32x1xf32>
    %c0_1 = arith.constant 0 : index
    %c0_2 = arith.constant 0 : index
    %1 = vector.load %arg3[%c0_1, %c0_2] : memref<32x1xf32, #tpu.memory_space<vmem>>, vector<32x1xf32>
    %c0_3 = arith.constant 0 : index
    %c0_4 = arith.constant 0 : index
    %2 = vector.load %arg6[%c0_3, %c0_4] : memref<1x32xf32, #tpu.memory_space<vmem>>, vector<1x32xf32>
    %c0_5 = arith.constant 0 : index
    %c0_6 = arith.constant 0 : index
    %3 = vector.load %arg7[%c0_5, %c0_6] : memref<1x1xf32, #tpu.memory_space<vmem>>, vector<1x1xf32>
    %c0_7 = arith.constant 0 : index
    %c0_8 = arith.constant 0 : index
    %4 = vector.load %arg1[%c0_7, %c0_8] : memref<1x256xf32, #tpu.memory_space<vmem>>, vector<1x128xf32>
    %c0_9 = arith.constant 0 : index
    %c128 = arith.constant 128 : index
    %5 = vector.load %arg1[%c0_9, %c128] : memref<1x256xf32, #tpu.memory_space<vmem>>, vector<1x128xf32>
    %6 = vector.broadcast %0 : vector<32x1xf32> to vector<32x128xf32>
    %7 = vector.broadcast %4 : vector<1x128xf32> to vector<32x128xf32>
    %8 = arith.mulf %6, %7 : vector<32x128xf32>
    %9 = vector.broadcast %1 : vector<32x1xf32> to vector<32x128xf32>
    %10 = arith.addf %8, %9 : vector<32x128xf32>
    %11 = vector.broadcast %0 : vector<32x1xf32> to vector<32x128xf32>
    %12 = vector.broadcast %5 : vector<1x128xf32> to vector<32x128xf32>
    %13 = arith.mulf %11, %12 : vector<32x128xf32>
    %14 = vector.broadcast %1 : vector<32x1xf32> to vector<32x128xf32>
    %15 = arith.addf %13, %14 : vector<32x128xf32>
    %16 = math.tanh %10 : vector<32x128xf32>
    %17 = math.tanh %15 : vector<32x128xf32>
    %c0_10 = arith.constant 0 : index
    %c0_11 = arith.constant 0 : index
    %c0_12 = arith.constant 0 : index
    %18 = vector.load %arg4[%c0_10, %c0_11, %c0_12] : memref<2x32x32xf32, #tpu.memory_space<vmem>>, vector<1x32x32xf32>
    %19 = vector.shape_cast %18 : vector<1x32x32xf32> to vector<32x32xf32>
    %c0_13 = arith.constant 0 : index
    %c0_14 = arith.constant 0 : index
    %c0_15 = arith.constant 0 : index
    %20 = vector.load %arg5[%c0_13, %c0_14, %c0_15] : memref<2x32x1xf32, #tpu.memory_space<vmem>>, vector<1x32x1xf32>
    %21 = vector.shape_cast %20 : vector<1x32x1xf32> to vector<32x1xf32>
    %cst = arith.constant dense<0.000000e+00> : vector<32x128xf32>
    %22 = tpu.matmul %19, %16, %cst {dimension_numbers = #tpu.dot_dimension_numbers<[1], [0], [0], [1], [0, 0, 1, 1], [], []>} : vector<32x32xf32>, vector<32x128xf32>, vector<32x128xf32> -> vector<32x128xf32>
    %23 = vector.broadcast %21 : vector<32x1xf32> to vector<32x128xf32>
    %24 = arith.addf %22, %23 : vector<32x128xf32>
    %cst_16 = arith.constant dense<0.000000e+00> : vector<32x128xf32>
    %25 = tpu.matmul %19, %17, %cst_16 {dimension_numbers = #tpu.dot_dimension_numbers<[1], [0], [0], [1], [0, 0, 1, 1], [], []>} : vector<32x32xf32>, vector<32x128xf32>, vector<32x128xf32> -> vector<32x128xf32>
    %26 = vector.broadcast %21 : vector<32x1xf32> to vector<32x128xf32>
    %27 = arith.addf %25, %26 : vector<32x128xf32>
    %28 = math.tanh %24 : vector<32x128xf32>
    %29 = math.tanh %27 : vector<32x128xf32>
    %c1 = arith.constant 1 : index
    %c0_17 = arith.constant 0 : index
    %c0_18 = arith.constant 0 : index
    %30 = vector.load %arg4[%c1, %c0_17, %c0_18] : memref<2x32x32xf32, #tpu.memory_space<vmem>>, vector<1x32x32xf32>
    %31 = vector.shape_cast %30 : vector<1x32x32xf32> to vector<32x32xf32>
    %c1_19 = arith.constant 1 : index
    %c0_20 = arith.constant 0 : index
    %c0_21 = arith.constant 0 : index
    %32 = vector.load %arg5[%c1_19, %c0_20, %c0_21] : memref<2x32x1xf32, #tpu.memory_space<vmem>>, vector<1x32x1xf32>
    %33 = vector.shape_cast %32 : vector<1x32x1xf32> to vector<32x1xf32>
    %cst_22 = arith.constant dense<0.000000e+00> : vector<32x128xf32>
    %34 = tpu.matmul %31, %28, %cst_22 {dimension_numbers = #tpu.dot_dimension_numbers<[1], [0], [0], [1], [0, 0, 1, 1], [], []>} : vector<32x32xf32>, vector<32x128xf32>, vector<32x128xf32> -> vector<32x128xf32>
    %35 = vector.broadcast %33 : vector<32x1xf32> to vector<32x128xf32>
    %36 = arith.addf %34, %35 : vector<32x128xf32>
    %cst_23 = arith.constant dense<0.000000e+00> : vector<32x128xf32>
    %37 = tpu.matmul %31, %29, %cst_23 {dimension_numbers = #tpu.dot_dimension_numbers<[1], [0], [0], [1], [0, 0, 1, 1], [], []>} : vector<32x32xf32>, vector<32x128xf32>, vector<32x128xf32> -> vector<32x128xf32>
    %38 = vector.broadcast %33 : vector<32x1xf32> to vector<32x128xf32>
    %39 = arith.addf %37, %38 : vector<32x128xf32>
    %40 = math.tanh %36 : vector<32x128xf32>
    %41 = math.tanh %39 : vector<32x128xf32>
    %cst_24 = arith.constant dense<0.000000e+00> : vector<1x128xf32>
    %42 = tpu.matmul %2, %40, %cst_24 {dimension_numbers = #tpu.dot_dimension_numbers<[1], [0], [0], [1], [0, 0, 1, 1], [], []>} : vector<1x32xf32>, vector<32x128xf32>, vector<1x128xf32> -> vector<1x128xf32>
    %43 = vector.broadcast %3 : vector<1x1xf32> to vector<1x128xf32>
    %44 = arith.addf %42, %43 : vector<1x128xf32>
    %c0_25 = arith.constant 0 : index
    %c0_26 = arith.constant 0 : index
    %45 = vector.load %arg8[%c0_25, %c0_26] : memref<1x256xf32, #tpu.memory_space<vmem>>, vector<1x128xf32>
    tpu.vector_store %arg8[%c0_25, %c0_26], %44 {strides = array<i32>} : memref<1x256xf32, #tpu.memory_space<vmem>>, vector<1x128xf32>,
    %cst_27 = arith.constant dense<0.000000e+00> : vector<1x128xf32>
    %46 = tpu.matmul %2, %41, %cst_27 {dimension_numbers = #tpu.dot_dimension_numbers<[1], [0], [0], [1], [0, 0, 1, 1], [], []>} : vector<1x32xf32>, vector<32x128xf32>, vector<1x128xf32> -> vector<1x128xf32>
    %47 = vector.broadcast %3 : vector<1x1xf32> to vector<1x128xf32>
    %48 = arith.addf %46, %47 : vector<1x128xf32>
    %c0_28 = arith.constant 0 : index
    %c128_29 = arith.constant 128 : index
    %49 = vector.load %arg8[%c0_28, %c128_29] : memref<1x256xf32, #tpu.memory_space<vmem>>, vector<1x128xf32>
    tpu.vector_store %arg8[%c0_28, %c128_29], %48 {strides = array<i32>} : memref<1x256xf32, #tpu.memory_space<vmem>>, vector<1x128xf32>,
    return
  }
  func.func @transform_0(%arg0: i32) -> (i32, i32) {
    %c0_i32 = arith.constant 0 : i32
    %c0_i32_0 = arith.constant 0 : i32
    return %c0_i32, %arg0 : i32, i32
  }
  func.func @transform_1(%arg0: i32) -> (i32, i32) {
    %c0_i32 = arith.constant 0 : i32
    %c0_i32_0 = arith.constant 0 : i32
    %c0_i32_1 = arith.constant 0 : i32
    return %c0_i32, %c0_i32_0 : i32, i32
  }
  func.func @transform_2(%arg0: i32) -> (i32, i32) {
    %c0_i32 = arith.constant 0 : i32
    %c0_i32_0 = arith.constant 0 : i32
    %c0_i32_1 = arith.constant 0 : i32
    return %c0_i32, %c0_i32_0 : i32, i32
  }
  func.func @transform_3(%arg0: i32) -> (i32, i32, i32) {
    %c0_i32 = arith.constant 0 : i32
    %c0_i32_0 = arith.constant 0 : i32
    %c0_i32_1 = arith.constant 0 : i32
    %c0_i32_2 = arith.constant 0 : i32
    return %c0_i32, %c0_i32_0, %c0_i32_1 : i32, i32, i32
  }
  func.func @transform_4(%arg0: i32) -> (i32, i32, i32) {
    %c0_i32 = arith.constant 0 : i32
    %c0_i32_0 = arith.constant 0 : i32
    %c0_i32_1 = arith.constant 0 : i32
    %c0_i32_2 = arith.constant 0 : i32
    return %c0_i32, %c0_i32_0, %c0_i32_1 : i32, i32, i32
  }
  func.func @transform_5(%arg0: i32) -> (i32, i32) {
    %c0_i32 = arith.constant 0 : i32
    %c0_i32_0 = arith.constant 0 : i32
    %c0_i32_1 = arith.constant 0 : i32
    return %c0_i32, %c0_i32_0 : i32, i32
  }
  func.func @transform_6(%arg0: i32) -> (i32, i32) {
    %c0_i32 = arith.constant 0 : i32
    %c0_i32_0 = arith.constant 0 : i32
    %c0_i32_1 = arith.constant 0 : i32
    return %c0_i32, %c0_i32_0 : i32, i32
  }
  func.func @transform_7(%arg0: i32) -> (i32, i32) {
    %c0_i32 = arith.constant 0 : i32
    %c0_i32_0 = arith.constant 0 : i32
    return %c0_i32, %arg0 : i32, i32
  }
}

</mosaic_0001>

<bundles_post_ra>
// kernel: tpu_custom_call.1
= control target key start
LH: loop header
LB: loop body
LE: loop exit
PB: predicated region body
PF: predicated region fallthrough
CT: control target
= control target key end

     0   :  { %s1158_s0 = inlined_call_operand.vmem [shape: f32[1,256], index: 0, kind: input, shape index: {}]   ;;  %s1159_s1 = inlined_call_operand.vmem [shape: f32[32,1], index: 1, kind: input, shape index: {}]   ;;  %s1160_s2 = inlined_call_operand.vmem [shape: f32[32,1], index: 2, kind: input, shape index: {}]   ;;  %s1161_s3 = inlined_call_operand.vmem [shape: f32[2,32,32], index: 3, kind: input, shape index: {}]   ;;  %s1162_s4 = inlined_call_operand.vmem [shape: f32[2,32,1], index: 4, kind: input, shape index: {}]   ;;  %s1163_s5 = inlined_call_operand.vmem [shape: f32[1,32], index: 5, kind: input, shape index: {}]   ;;  %s1164_s6 = inlined_call_operand.<no memory space> [shape: f32[1,1], index: 6, kind: input, shape index: {}]   ;;  %s1165_s7 = inlined_call_operand.hbm [shape: f32[1,256], index: 7, kind: output, shape index: {}]  }
   0x1   :  { %v12_v0 = vstv %s1164_s6 }
   0x2   :  { %13 = vst [vmem:[#allocation2] sm:$0x1] %v12_v0 }
   0x3   :  { %v33_v1 = vld [vmem:[%s1160_s2] sm:$0xff]  ;;  %v999_v3 = vmov 0   ;;  %v34_v4 = vld [vmem:[%s1160_s2 + $0x8] sm:$0xff] }
   0x4   :  { %v29_v2 = vld [vmem:[%s1159_s1] sm:$0xff]  ;;  %926 = vset.pattern.permute.xlu1 %v999_v3  ;;  %925 = vset.pattern.permute.xlu0 %v999_v3  ;;  %v30_v5 = vld [vmem:[%s1159_s1 + $0x8] sm:$0xff] }
   0x5   :  { %73 = vperm.xlu1 %926, %v33_v1   ;;  %43 = vperm.xlu0 %925, %v29_v2  }
   0x9   :  { %78 = vperm.xlu1 %926, %v34_v4   ;;  %48 = vperm.xlu0 %925, %v30_v5  }
   0xa   :  { %14 = vsyncpa [#allocation4], 0  ;;  %v32_v6 = vld [vmem:[%s1159_s1 + $0x18] sm:$0xff]  ;;  %v31_v7 = vld [vmem:[%s1159_s1 + $0x10] sm:$0xff]  ;;  %vm145_vm0 = vcmask 261120   ;;  %vm1001_vm1 = vmmov 0  }
   0xb   :  { %v36_v8 = vld [vmem:[%s1160_s2 + $0x18] sm:$0xff]  ;;  %v35_v9 = vld [vmem:[%s1160_s2 + $0x10] sm:$0xff]  ;;  %v122_v10 = vld [vmem:[%s1162_s4 + $0x8] sm:$0xff]  ;;  %s1003_s25 = smov [#allocation3]  }
   0xc   :  { %v121_v11 = vld [vmem:[%s1162_s4] sm:$0xff]  ;;  %v124_v12 = vld [vmem:[%s1162_s4 + $0x18] sm:$0xff]  ;;  %v123_v13 = vld [vmem:[%s1162_s4 + $0x10] sm:$0xff]  ;;  %s720_s26 = sshll.u32 %s1003_s25, 4  ;;  %s721_s26 = int_to_ptr.vmem [resolvable:$true] %s720_s26 }
   0xd   :  { %58 = vperm.xlu1 %926, %v32_v6   ;;  %53 = vperm.xlu0 %925, %v31_v7   ;;  %v743_v14 = vld [vmem:[%s1162_s4 + $0x28] sm:$0xff]  ;;  %v742_v15 = vld [vmem:[%s1162_s4 + $0x20] sm:$0xff]  ;;  %v745_v16 = vld [vmem:[%s1162_s4 + $0x38] sm:$0xff]  ;;  %p980_p1 = scmp.lt.s32.totalorder %s721_s26, %s721_s26 }
   0xe   :  { %v744_v17 = vld [vmem:[%s1162_s4 + $0x30] sm:$0xff]  ;;  %v38_v18 = vld [vmem:[#allocation2] sm:$0x1]  ;;  %v729_v21 = vld [vmem:[%s1158_s0 + $0x1] ss:$0 sm:$0xff] }
   0xf   :  { %v117_v19 = vld [vmem:[%s1161_s3] sm:$0xff]  ;;  %v118_v58 = vld [vmem:[%s1161_s3 + $0x8] sm:$0xff]  ;;  %v119_v59 = vld [vmem:[%s1161_s3 + $0x10] sm:$0xff] }
  0x10   :  { %806 = vmatprep.mubr.msk.f32.mxu0 %vm145_vm0, %v117_v19  ;;  %820 = vmatprep.mubr.msk.f32.mxu1 %vm145_vm0, %v117_v19  ;;  %v728_v20 = vld [vmem:[%s1158_s0] ss:$0 sm:$0xff]  ;;  %v120_v60 = vld [vmem:[%s1161_s3 + $0x18] sm:$0xff] }
  0x11   :  { %88 = vperm.xlu1 %926, %v36_v8   ;;  %83 = vperm.xlu0 %925, %v35_v9   ;;  %v738_v61 = vld [vmem:[%s1161_s3 + $0x20] sm:$0xff] }
  0x15   :  { %132 = vperm.xlu1 %926, %v122_v10   ;;  %127 = vperm.xlu0 %925, %v121_v11  }
  0x19   :  { %142 = vperm.xlu1 %926, %v124_v12   ;;  %137 = vperm.xlu0 %925, %v123_v13  }
  0x1d   :  { %353 = vperm.xlu1 %926, %v743_v14   ;;  %348 = vperm.xlu0 %925, %v742_v15  }
  0x21   :  { %363 = vperm.xlu1 %926, %v745_v16   ;;  %358 = vperm.xlu0 %925, %v744_v17  }
  0x25   :  { %558 = vperm.xlu0 %925, %v38_v18  }
  0x84   :  { %v74_v22 = vpop.permute.xlu1 %73  ;;  %v44_v23 = vpop.permute.xlu0 %43 }
  0x85   :  { %v67_v24 = vmul.f32 %v728_v20, %v44_v23  ;;  %v101_v25 = vmul.f32 %v729_v21, %v44_v23 }
  0x87   :  { %v91_v26 = vadd.f32 %v74_v22, %v67_v24  ;;  %v105_v27 = vadd.f32 %v101_v25, %v74_v22 }
  0x88   :  { %v79_v28 = vpop.permute.xlu1 %78  ;;  %v49_v29 = vpop.permute.xlu0 %48 }
  0x89   :  { %v68_v30 = vmul.f32 %v728_v20, %v49_v29  ;;  %v102_v31 = vmul.f32 %v729_v21, %v49_v29  ;;  %927 = vtanh.f32 %v91_v26 }
  0x8a   :  { %929 = vtanh.f32 %v105_v27 }
  0x8b   :  { %v92_v32 = vadd.f32 %v79_v28, %v68_v30  ;;  %v106_v33 = vadd.f32 %v102_v31, %v79_v28  ;;  %v739_v30 = vld [vmem:[%s1161_s3 + $0x28] sm:$0xff]  ;;  %v740_v31 = vld [vmem:[%s1161_s3 + $0x30] sm:$0xff] }
  0x8c   :  { %v59_v34 = vpop.permute.xlu1 %58  ;;  %v54_v35 = vpop.permute.xlu0 %53 }
  0x8d   :  { %931 = vtanh.f32 %v92_v32  ;;  %v70_v36 = vmul.f32 %v728_v20, %v59_v34  ;;  %v104_v37 = vmul.f32 %v729_v21, %v59_v34  ;;  %v69_v38 = vmul.f32 %v728_v20, %v54_v35  ;;  %v741_v32 = vld [vmem:[%s1161_s3 + $0x38] sm:$0xff] }
  0x8e   :  { %933 = vtanh.f32 %v106_v33  ;;  %v103_v39 = vmul.f32 %v729_v21, %v54_v35  ;;  %v1000_v33 = vmov 0.0|0.0   ;;  %v1002_v34 = vmov 0.0  }
  0x90   :  { %v89_v40 = vpop.permute.xlu1 %88  ;;  %v84_v41 = vpop.permute.xlu0 %83 }
  0x91   :  { %v94_v42 = vadd.f32 %v89_v40, %v70_v36  ;;  %v108_v43 = vadd.f32 %v104_v37, %v89_v40  ;;  %v93_v44 = vadd.f32 %v84_v41, %v69_v38  ;;  %v107_v45 = vadd.f32 %v103_v39, %v84_v41 }
  0x93   :  { %935 = vtanh.f32 %v94_v42  ;;  %v928_v46 = vpop.eup %927 }
  0x94   :  { %937 = vtanh.f32 %v108_v43  ;;  %v930_v47 = vpop.eup %929  ;;  %v133_v62 = vpop.permute.xlu1 %132 }
  0x95   :  { %939 = vtanh.f32 %v93_v44  ;;  %v128_v63 = vpop.permute.xlu0 %127 }
  0x96   :  { %941 = vtanh.f32 %v107_v45 }
  0x97   :  { %v932_v48 = vpop.eup %931 }
  0x98   :  { %v934_v49 = vpop.eup %933  ;;  %v876_v50 = vpack.c.bf16 %v932_v48, %v928_v46  ;;  %v143_v7 = vpop.permute.xlu1 %142 }
  0x99   :  { %v884_v51 = vpack.c.bf16 %v934_v49, %v930_v47  ;;  %v138_v9 = vpop.permute.xlu0 %137 }
  0x9a   :  { %877 = vmatprep.subr.bf16.mxu0 %v876_v50 }
  0x9b   :  { %885 = vmatprep.subr.bf16.mxu1 %v884_v51  ;;  %879 = vmatpush3.bf16.msra.mxu0 %v876_v50 }
  0x9c   :  { %887 = vmatpush3.bf16.msra.mxu1 %v884_v51  ;;  %v354_v35 = vpop.permute.xlu1 %353 }
  0x9d   :  { %v936_v52 = vpop.eup %935  ;;  %v349_v36 = vpop.permute.xlu0 %348 }
  0x9e   :  { %v938_v53 = vpop.eup %937 }
  0x9f   :  { %v940_v54 = vpop.eup %939 }
  0xa0   :  { %v942_v55 = vpop.eup %941  ;;  %v880_v56 = vpack.c.bf16 %v936_v52, %v940_v54  ;;  %v364_v44 = vpop.permute.xlu1 %363 }
  0xa1   :  { %v888_v57 = vpack.c.bf16 %v938_v53, %v942_v55  ;;  %v359_v46 = vpop.permute.xlu0 %358 }
  0xa2   :  { %881 = vmatprep.subr.bf16.mxu0 %v880_v56 }
  0xa3   :  { %889 = vmatprep.subr.bf16.mxu1 %v888_v57  ;;  %883 = vmatpush3.bf16.msra.mxu0 %v880_v56 }
  0xa4   :  { %891 = vmatpush3.bf16.msra.mxu1 %v888_v57 }
  0xa6   :  { %807 = vmatmul.mubr.msk.f32.vlgmr.msra.gmra.mrb[0].mxu0 %vm145_vm0, %v118_v58 }
  0xa7   :  { %821 = vmatmul.mubr.msk.f32.vlgmr.msra.gmra.mrb[0].mxu1 %vm145_vm0, %v118_v58  ;;  %809 = vmatprep.mubr.msk.f32.mxu0 %vm145_vm0, %v119_v59 }
  0xa8   :  { %823 = vmatprep.mubr.msk.f32.mxu1 %vm145_vm0, %v119_v59 }
  0xaa   :  { %810 = vmatmul.mubr.msk.f32.gmra.mrb[2].mxu0 %vm145_vm0, %v120_v60 }
  0xab   :  { %824 = vmatmul.mubr.msk.f32.gmra.mrb[2].mxu1 %vm145_vm0, %v120_v60  ;;  %834 = vmatprep.mubr.msk.f32.mxu0 %vm145_vm0, %v738_v61 }
  0xac   :  { %848 = vmatprep.mubr.msk.f32.mxu1 %vm145_vm0, %v738_v61 }
 0x179   :  { %v808_v0 = vpop.f32.mrb[0].mxu0 }
 0x17a   :  { %v230_v1 = vadd.f32 %v808_v0, %v133_v62  ;;  %v822_v2 = vpop.f32.mrb[0].mxu1  ;;  %v224_v3 = vpop.f32.mrb[1].mxu0 }
 0x17b   :  { %v315_v4 = vadd.f32 %v822_v2, %v133_v62  ;;  %v225_v5 = vadd.f32 %v224_v3, %v128_v63  ;;  %v309_v6 = vpop.f32.mrb[1].mxu1  ;;  %v37_v3 = vld [vmem:[%s1163_s5] sm:$0x1]  ;;  %s975_s5 = scalar_lea.vmem %s721_s26, 32 }
 0x17c   :  { %943 = vtanh.f32 %v230_v1  ;;  %v310_v8 = vadd.f32 %v309_v6, %v128_v63  ;;  %p976_p0 = scmp.ne.s32.totalorder %s721_s26, %s975_s5  ;;  %p981_p2 = scmp.lt.s32.totalorder %s975_s5, %s975_s5 }
 0x17d   :  { %945 = vtanh.f32 %v315_v4  ;;  %v811_v10 = vpop.f32.mrb[2].mxu0  ;;  %v561_v4 = vlaneseq }
 0x17e   :  { %947 = vtanh.f32 %v225_v5  ;;  %v240_v11 = vadd.f32 %v811_v10, %v143_v7  ;;  %v825_v12 = vpop.f32.mrb[2].mxu1  ;;  %v234_v13 = vpop.f32.mrb[3].mxu0  ;;  %p982_p3 = por %p981_p2, %p980_p1 }
 0x17f   :  { %949 = vtanh.f32 %v310_v8  ;;  %v325_v14 = vadd.f32 %v825_v12, %v143_v7  ;;  %v235_v15 = vadd.f32 %v234_v13, %v138_v9  ;;  %v319_v16 = vpop.f32.mrb[3].mxu1  ;;  %v562_v5 = vshrl.u32 %v561_v4, 7  ;;  %v559_v7 = vpop.permute.xlu0 %558 }
 0x180   :  { %951 = vtanh.f32 %v240_v11  ;;  %v320_v17 = vadd.f32 %v319_v16, %v138_v9  ;;  %vm640_vm2 = vcmp.lt.s32.totalorder %v561_v4, 128  ;;  %p983_p4 = pnand %p982_p3, %p976_p0 }
 0x181   :  { %953 = vtanh.f32 %v325_v14  ;;  %v563_v6 = vsub.s32 0, %v562_v5 }
 0x182   :  { %955 = vtanh.f32 %v235_v15 }
 0x183   :  { %957 = vtanh.f32 %v320_v17  ;;  %v564_v8 = vrot.slane %v559_v7, %v563_v6 }
 0x186   :  { %v944_v18 = vpop.eup %943 }
 0x187   :  { %v946_v19 = vpop.eup %945 }
 0x188   :  { %v948_v20 = vpop.eup %947 }
 0x189   :  { %v950_v21 = vpop.eup %949  ;;  %v892_v22 = vpack.c.bf16 %v944_v18, %v948_v20 }
 0x18a   :  { %v952_v23 = vpop.eup %951  ;;  %v900_v24 = vpack.c.bf16 %v946_v19, %v950_v21 }
 0x18b   :  { %v954_v25 = vpop.eup %953  ;;  %893 = vmatprep.subr.bf16.mxu0 %v892_v22 }
 0x18c   :  { %v956_v26 = vpop.eup %955  ;;  %901 = vmatprep.subr.bf16.mxu1 %v900_v24  ;;  %895 = vmatpush3.bf16.msra.mxu0 %v892_v22 }
 0x18d   :  { %v958_v27 = vpop.eup %957  ;;  %903 = vmatpush3.bf16.msra.mxu1 %v900_v24  ;;  %v896_v28 = vpack.c.bf16 %v952_v23, %v956_v26 }
 0x18e   :  { %v904_v29 = vpack.c.bf16 %v954_v25, %v958_v27 }
 0x18f   :  { %897 = vmatprep.subr.bf16.mxu0 %v896_v28 }
 0x190   :  { %905 = vmatprep.subr.bf16.mxu1 %v904_v29  ;;  %899 = vmatpush3.bf16.msra.mxu0 %v896_v28 }
 0x191   :  { %907 = vmatpush3.bf16.msra.mxu1 %v904_v29  ;;  %908 = vmatprep.subr.bf16.mxu0 %v1000_v33 }
 0x192   :  { %914 = vmatprep.subr.bf16.mxu1 %v1000_v33 }
 0x193   :  { %835 = vmatmul.mubr.msk.f32.vlgmr.msra.gmra.mrb[4].mxu0 %vm145_vm0, %v739_v30 }
 0x194   :  { %849 = vmatmul.mubr.msk.f32.vlgmr.msra.gmra.mrb[4].mxu1 %vm145_vm0, %v739_v30  ;;  %837 = vmatprep.mubr.msk.f32.mxu0 %vm145_vm0, %v740_v31 }
 0x195   :  { %851 = vmatprep.mubr.msk.f32.mxu1 %vm145_vm0, %v740_v31 }
 0x197   :  { %838 = vmatmul.mubr.msk.f32.gmra.mrb[6].mxu0 %vm145_vm0, %v741_v32 }
 0x198   :  { %852 = vmatmul.mubr.msk.f32.gmra.mrb[6].mxu1 %vm145_vm0, %v741_v32  ;;  %862 = vmatprep.mubr.msk.f32.mxu0 %vm1001_vm1, %v1002_v34 }
 0x199   :  { %873 = vmatprep.mubr.msk.f32.mxu1 %vm1001_vm1, %v1002_v34 }
 0x266   :  { %v836_v37 = vpop.f32.mrb[4].mxu0 }
 0x267   :  { %v450_v38 = vadd.f32 %v836_v37, %v354_v35  ;;  %v850_v39 = vpop.f32.mrb[4].mxu1  ;;  %v444_v40 = vpop.f32.mrb[5].mxu0 }
 0x268   :  { %v535_v41 = vadd.f32 %v850_v39, %v354_v35  ;;  %v445_v42 = vadd.f32 %v444_v40, %v349_v36  ;;  %v529_v43 = vpop.f32.mrb[5].mxu1 }
 0x269   :  { %959 = vtanh.f32 %v450_v38  ;;  %v530_v45 = vadd.f32 %v529_v43, %v349_v36 }
 0x26a   :  { %961 = vtanh.f32 %v535_v41  ;;  %v839_v47 = vpop.f32.mrb[6].mxu0 }
 0x26b   :  { %963 = vtanh.f32 %v445_v42  ;;  %v460_v48 = vadd.f32 %v839_v47, %v364_v44  ;;  %v853_v49 = vpop.f32.mrb[6].mxu1  ;;  %v454_v50 = vpop.f32.mrb[7].mxu0 }
 0x26c   :  { %965 = vtanh.f32 %v530_v45  ;;  %v545_v51 = vadd.f32 %v853_v49, %v364_v44  ;;  %v455_v52 = vadd.f32 %v454_v50, %v359_v46  ;;  %v539_v53 = vpop.f32.mrb[7].mxu1 }
 0x26d   :  { %967 = vtanh.f32 %v460_v48  ;;  %v540_v54 = vadd.f32 %v539_v53, %v359_v46 }
 0x26e   :  { %969 = vtanh.f32 %v545_v51 }
 0x26f   :  { %971 = vtanh.f32 %v455_v52 }
 0x270   :  { %973 = vtanh.f32 %v540_v54 }
 0x273   :  { %v960_v55 = vpop.eup %959 }
 0x274   :  { %v962_v56 = vpop.eup %961 }
 0x275   :  { %v964_v57 = vpop.eup %963 }
 0x276   :  { %v966_v58 = vpop.eup %965  ;;  %v909_v59 = vpack.c.bf16 %v960_v55, %v964_v57 }
 0x277   :  { %v968_v60 = vpop.eup %967  ;;  %v915_v61 = vpack.c.bf16 %v962_v56, %v966_v58 }
 0x278   :  { %v970_v62 = vpop.eup %969  ;;  %910 = vmatpush3.bf16.msra.mxu0 %v909_v59 }
 0x279   :  { %v972_v63 = vpop.eup %971  ;;  %916 = vmatpush3.bf16.msra.mxu1 %v915_v61  ;;  %911 = vmatprep.subr.bf16.mxu0 %v1000_v33 }
 0x27a   :  { %v974_v0 = vpop.eup %973  ;;  %917 = vmatprep.subr.bf16.mxu1 %v1000_v33  ;;  %v912_v1 = vpack.c.bf16 %v968_v60, %v972_v63 }
 0x27b   :  { %v918_v2 = vpack.c.bf16 %v970_v62, %v974_v0 }
 0x27c   :  { %913 = vmatpush3.bf16.msra.mxu0 %v912_v1 }
 0x27d   :  { %919 = vmatpush3.bf16.msra.mxu1 %v918_v2 }
 0x27f   :  { %863 = vmatmul.mubr.msk.f32.vlgmr.msra.gmra.mrb[8].mxu0 %vm145_vm0, %v37_v3 }
 0x280   :  { %874 = vmatmul.mubr.msk.f32.vlgmr.msra.gmra.mrb[8].mxu1 %vm145_vm0, %v37_v3 }
 0x352   :  { %v634_v9 = vpop.f32.mrb[8].mxu0 }
 0x353   :  { %v635_v10 = vadd.f32 %v634_v9, %v564_v8  ;;  %v709_v11 = vpop.f32.mrb[8].mxu1  ;;  %v864_v12 = vpop.f32.mrb[9].mxu0 }
 0x354   :  { %v710_v13 = vadd.f32 %v709_v11, %v564_v8  ;;  %v875_v14 = vpop.f32.mrb[9].mxu1 }
 0x355   :  { %642 = vst.msk [vmem:[#allocation3] sm:$0x1] %vm640_vm2, %v635_v10 }
 0x356   :  { %713 = vst.msk [vmem:[#allocation3 + $0x1] sm:$0x1] %vm640_vm2, %v710_v13 }
 0x357   :  { %986 = shalt.err (!%p983_p4)
}
 0x358   :  { %s987_s29 = scalar_lea.hbm %s1165_s7, 32 }
 0x359   :  { %p988_p5 = scmp.ne.s32.totalorder %s1165_s7, %s987_s29  ;;  %p991_p6 = scmp.lt.u32.totalorder %s987_s29, %s1165_s7 }
 0x35b   :  { %p993_p7 = pnand %p991_p6, %p988_p5 }
 0x35d   :  { %996 = shalt.err (!%p993_p7)
}
 0x35e   :  { %723 = dma.vmem_to_hbm [thread:$0]  %s721_s26, 32, %s1165_s7, [#allocation4]  }
 0x35f   :  { %997 = dma.done.wait [#allocation4], 32  }
 0x360   :  { %998 = vsyncadd [#allocation4], 4294967264 }
 0x361   :  { %727 = vsyncpa [#allocation4], 1 }

</bundles_post_ra>
